<compile_context>
chip_gen: v6e
topology: v6e:2x2x1
jax: 0.10.0
libtpu: 0.0.40
codegen_flags: <defaults>
</compile_context>

<pallas_src>
import jax
import jax.numpy as jnp
from jax.experimental import pallas as pl
from jax.experimental.pallas import tpu as pltpu

LANE = 128
SUB = 32          # int8 sublane packing: native tile is (32, 128)


def _round_up(x, m):
    return ((x + m - 1) // m) * m


def _cdiv(a, b):
    return (a + b - 1) // b


def _nbytes(a):
    return int(a.size) * a.dtype.itemsize


def _pad2d(a, rows, cols, dtype):
    """Zero-pad a 2-D array to (rows, cols) and cast to dtype."""
    out = jnp.zeros((rows, cols), dtype)
    return out.at[: a.shape[0], : a.shape[1]].set(a.astype(dtype))


# ---------------------------------------------------------------------------
# Fused kernel: FC1 + FC2 + elementwise product + 2-layer MLP head, per batch
# tile.  All padded regions are zero so results for the real rows/cols are
# exact (up to bf16 matmul inputs with f32 accumulation).
# ---------------------------------------------------------------------------
def _jncf_fused_kernel(ur_ref, ir_ref, w1_ref, b1_ref, w2_ref, b2_ref,
                       wa_ref, ba_ref, wb_ref, o_ref):
    # int8 rating rows -> bf16 (VPU cast; 0/1 values are exact), then MXU
    # matmuls with f32 accumulation + f32 bias epilogue.
    ur = ur_ref[...].astype(jnp.bfloat16)
    ir = ir_ref[...].astype(jnp.bfloat16)
    u = jnp.dot(ur, w1_ref[...], preferred_element_type=jnp.float32) + b1_ref[...]
    it = jnp.dot(ir, w2_ref[...], preferred_element_type=jnp.float32) + b2_ref[...]
    # Elementwise product (VPU, f32).
    h = u * it
    # W1a: Linear(D, D) kept in f32 (dp x dp is cheap; better accuracy) + ReLU.
    h2 = jnp.dot(h, wa_ref[...], preferred_element_type=jnp.float32) + ba_ref[...]
    h2 = jnp.maximum(h2, 0.0)
    # W1b: Linear(D, 1, bias=False) followed by .sum(dim=1, keepdim=True):
    # VPU multiply + cross-lane (XLU) reduce instead of an N=1 MXU matmul
    # (the extra .sum over a [B,1] tensor in the reference is a no-op).
    row = jnp.sum(h2 * wb_ref[...], axis=1)                 # (tile_m,)
    # Lane-dense output row: full vector stores, no vst.msk on a last-dim-1.
    o_ref[...] = row[None, None, :].astype(o_ref.dtype)


def _fused_head_call(ur, ir, packed, tm):
    bp, k1p = ur.shape
    _, k2p = ir.shape
    dp = packed["dp"]
    n_tiles = bp // tm

    flops = 2 * bp * dp * (k1p + k2p + dp) + 6 * bp * dp
    bytes_accessed = (_nbytes(ur) + _nbytes(ir)
                      + _nbytes(packed["fc1_w_p"]) + _nbytes(packed["fc2_w_p"])
                      + _nbytes(packed["w1a_w_p"]) + _nbytes(packed["fc1_b_p"])
                      + _nbytes(packed["fc2_b_p"]) + _nbytes(packed["w1a_b_p"])
                      + _nbytes(packed["w1b_w_p"]) + bp * 4)

    # VMEM budget: single-buffered resident weights + double-buffered int8
    # rating tiles + f32 intermediates + headroom.  128-MiB parts (v5e/v6e)
    # are allowed up to ~96 MiB.
    # TODO(synk): on v7x (64 MiB VMEM) cap this near ~52 MiB and halve tile_m.
    weights_b = (k1p + k2p) * dp * 2 + dp * dp * 4 + 4 * dp * 4
    io_b = 2 * tm * (k1p + k2p) * 1                 # 2 pipeline buffers, int8
    inter_b = 4 * tm * dp * 4 + 2 * tm * 4
    est = weights_b + io_b + inter_b
    vmem_limit = int(min(max(2 * est + (8 << 20), 32 << 20), 96 << 20))

    resident = dict(pipeline_mode=pl.Buffered(1))   # constant blocks: no double-buffer

    return pl.pallas_call(
        _jncf_fused_kernel,
        out_shape=jax.ShapeDtypeStruct((n_tiles, 1, tm), jnp.float32),
        grid=(n_tiles,),
        in_specs=[
            pl.BlockSpec((tm, k1p), lambda i: (i, 0)),                 # gathered user rating rows (int8)
            pl.BlockSpec((tm, k2p), lambda i: (i, 0)),                 # gathered item rating rows (int8)
            pl.BlockSpec((k1p, dp), lambda i: (0, 0), **resident),     # FC1 weight (bf16, resident)
            pl.BlockSpec((1, dp), lambda i: (0, 0)),                   # FC1 bias (f32)
            pl.BlockSpec((k2p, dp), lambda i: (0, 0), **resident),     # FC2 weight (bf16, resident)
            pl.BlockSpec((1, dp), lambda i: (0, 0)),                   # FC2 bias (f32)
            pl.BlockSpec((dp, dp), lambda i: (0, 0), **resident),      # W1a weight (f32, resident)
            pl.BlockSpec((1, dp), lambda i: (0, 0)),                   # W1a bias (f32)
            pl.BlockSpec((1, dp), lambda i: (0, 0)),                   # W1b weight row (f32, VPU reduce)
        ],
        out_specs=pl.BlockSpec((1, 1, tm), lambda i: (i, 0, 0)),
        compiler_params=pltpu.CompilerParams(
            dimension_semantics=("parallel",),
            vmem_limit_bytes=vmem_limit,
        ),
        cost_estimate=pl.CostEstimate(
            flops=int(flops), transcendentals=0,
            bytes_accessed=int(bytes_accessed)),
    )(ur, ir,
      packed["fc1_w_p"], packed["fc1_b_p"],
      packed["fc2_w_p"], packed["fc2_b_p"],
      packed["w1a_w_p"], packed["w1a_b_p"], packed["w1b_w_p"])


# ---------------------------------------------------------------------------
# Parameters (f32, matching the PyTorch module) and kernel-ready packing.
# ---------------------------------------------------------------------------
def init_params(key, num_users, num_items, embedding_dim, reg):
    ks = jax.random.split(key, 8)
    s = 0.05
    return {
        # Embeddings exist on the module; the ItemsEmbedding(items) lookup in
        # forward is dead code (result unused), so it never feeds the kernel.
        "users_emb": s * jax.random.normal(ks[0], (num_users, embedding_dim), jnp.float32),
        "items_emb": s * jax.random.normal(ks[1], (num_items, embedding_dim), jnp.float32),
        # FC1: Linear(num_items -> D); stored transposed ([in, out]) so y = x@W + b
        "fc1_w": s * jax.random.normal(ks[2], (num_items, embedding_dim), jnp.float32),
        "fc1_b": s * jax.random.normal(ks[3], (embedding_dim,), jnp.float32),
        # FC2: Linear(num_users -> D)
        "fc2_w": s * jax.random.normal(ks[4], (num_users, embedding_dim), jnp.float32),
        "fc2_b": s * jax.random.normal(ks[5], (embedding_dim,), jnp.float32),
        # W1: Linear(D -> D) , ReLU , Linear(D -> 1, bias=False)
        "w1a_w": s * jax.random.normal(ks[6], (embedding_dim, embedding_dim), jnp.float32),
        "w1a_b": jnp.zeros((embedding_dim,), jnp.float32),
        "w1b_w": s * jax.random.normal(ks[7], (embedding_dim, 1), jnp.float32),
        "reg": jnp.float32(reg),
    }


def pack_params(params):
    """Zero-pad feature/reduction dims to multiples of 128 (lane-dense, MXU
    aligned).  Large FC weights go to bf16 (f32 accumulation in-kernel); the
    small W1a weight, biases and the W1b row stay f32."""
    k1, d = params["fc1_w"].shape     # num_items, D
    k2, _ = params["fc2_w"].shape     # num_users, D
    dp = _round_up(d, LANE)
    k1p = _round_up(k1, LANE)
    k2p = _round_up(k2, LANE)
    return {
        "num_items": k1, "num_users": k2, "d": d,
        "k1p": k1p, "k2p": k2p, "dp": dp,
        "fc1_w_p": _pad2d(params["fc1_w"], k1p, dp, jnp.bfloat16),
        "fc2_w_p": _pad2d(params["fc2_w"], k2p, dp, jnp.bfloat16),
        "w1a_w_p": _pad2d(params["w1a_w"], dp, dp, jnp.float32),
        "fc1_b_p": _pad2d(params["fc1_b"].reshape(1, -1), 1, dp, jnp.float32),
        "fc2_b_p": _pad2d(params["fc2_b"].reshape(1, -1), 1, dp, jnp.float32),
        "w1a_b_p": _pad2d(params["w1a_b"].reshape(1, -1), 1, dp, jnp.float32),
        "w1b_w_p": _pad2d(params["w1b_w"].reshape(1, -1), 1, dp, jnp.float32),
        "reg": params["reg"],
    }


def pack_ratings(packed, users_ratings, items_ratings, storage_dtype=jnp.int8):
    """One-time packing of the dataset-constant rating matrices: zero-pad the
    reduction dim to a multiple of 128 and store narrow.  int8 is exact for
    the 0/1 implicit-feedback matrices used here; pass bf16 for real-valued
    ratings.  Done once so the per-call path is just a row gather."""
    nu = users_ratings.shape[0]
    ni = items_ratings.shape[0]
    return {
        "ur_q": _pad2d(users_ratings, nu, packed["k1p"], storage_dtype),
        "ir_q": _pad2d(items_ratings, ni, packed["k2p"], storage_dtype),
    }


# ---------------------------------------------------------------------------
# Forward pass
# ---------------------------------------------------------------------------
def jncf_dot_forward(packed, ratings_q, users, items, *, tile_m=512):
    # `self._ItemsEmbedding(items)` in the PyTorch forward is dead code (its
    # result is never used) and is intentionally not computed.
    b = users.shape[0]

    # Batch tile: multiple of 32 (int8 sublane packing); prefer >= 2 grid
    # steps so dimension_semantics=("parallel",) can shard across TensorCores.
    tm = _round_up(min(tile_m, max(b, 1)), SUB)
    if b > SUB and _cdiv(b, tm) < 2:
        tm = _round_up(_cdiv(b, 2), SUB)
    bp = _round_up(b, tm)

    # Pad the *indices* (not the gathered slabs) so the single XLA gather
    # directly yields grid-aligned int8 operands — no extra pad/cast passes.
    users_p = jnp.zeros((bp,), users.dtype).at[:b].set(users)
    items_p = jnp.zeros((bp,), items.dtype).at[:b].set(items)
    ur = ratings_q["ur_q"][users_p]     # [bp, k1p] int8
    ir = ratings_q["ir_q"][items_p]     # [bp, k2p] int8
    # TODO(synk): fold this gather into the kernel (PrefetchScalarGridSpec +
    # per-row make_async_copy from HBM) and add a K-reduction grid axis for
    # very large num_users/num_items (VMEM-limited, esp. v7x).

    out = _fused_head_call(ur, ir, packed, tm)       # [n_tiles, 1, tm] f32
    inference = out.reshape(bp, 1)[:b]
    regs = packed["reg"] * 0.0                       # matches `self.reg * 0`
    return inference, regs


# Pure-JAX f32 reference (mirrors the PyTorch forward) for a correctness check.
def jncf_dot_reference(params, users, items, users_ratings, items_ratings):
    alluser = users_ratings @ params["fc1_w"] + params["fc1_b"]
    allitem = items_ratings @ params["fc2_w"] + params["fc2_b"]
    u = alluser[users]
    it = allitem[items]
    h = u * it
    h2 = jnp.maximum(h @ params["w1a_w"] + params["w1a_b"], 0.0)
    inference = (h2 @ params["w1b_w"]).sum(axis=1, keepdims=True)
    return inference, params["reg"] * 0.0


# ---------------------------------------------------------------------------
if __name__ == "__main__":
    num_users = 32
    num_items = 48
    embedding_dim = 16
    batch = 40          # not a tile multiple -> exercises batch padding + grid>1
    reg = 0.01

    key = jax.random.PRNGKey(0)
    k_params, k_ur, k_ir, k_u, k_i = jax.random.split(key, 5)

    params = init_params(k_params, num_users, num_items, embedding_dim, reg)
    packed = pack_params(params)

    # users_ratings: [num_users, num_items], items_ratings: [num_items, num_users]
    # (binary implicit feedback -> exact in int8/bf16)
    users_ratings = (jax.random.uniform(k_ur, (num_users, num_items)) < 0.2).astype(jnp.float32)
    items_ratings = (jax.random.uniform(k_ir, (num_items, num_users)) < 0.2).astype(jnp.float32)
    ratings_q = pack_ratings(packed, users_ratings, items_ratings)

    users = jax.random.randint(k_u, (batch,), 0, num_users)
    items = jax.random.randint(k_i, (batch,), 0, num_items)

    # small tile_m so the demo exercises a multi-step "parallel" grid
    inference, regs = jncf_dot_forward(packed, ratings_q, users, items, tile_m=32)
    inference = jax.block_until_ready(inference)
    regs = jax.block_until_ready(regs)

    ref_inf, _ = jncf_dot_reference(params, users, items,
                                    users_ratings, items_ratings)

    assert inference.shape == (batch, 1)
    # bf16 FC weights with f32 accumulation: error grows with the reduction
    # size; at these small demo dims it is well under this tolerance.
    max_err = float(jnp.max(jnp.abs(inference - ref_inf)))
    assert max_err < 2e-2, f"max abs error vs f32 reference: {max_err}"
    assert float(regs) == 0.0
    print("KERNEL_OK")
</pallas_src>

<mosaic_0001>
module attributes {stable_mosaic.version = 11 : i64} {
  func.func @_jncf_fused_kernel(%arg0: i32, %arg1: memref<32x128xi8, #tpu.memory_space<vmem>>, %arg2: memref<32x128xi8, #tpu.memory_space<vmem>>, %arg3: memref<128x128xbf16, #tpu.memory_space<vmem>>, %arg4: memref<1x128xf32, #tpu.memory_space<vmem>>, %arg5: memref<128x128xbf16, #tpu.memory_space<vmem>>, %arg6: memref<1x128xf32, #tpu.memory_space<vmem>>, %arg7: memref<128x128xf32, #tpu.memory_space<vmem>>, %arg8: memref<1x128xf32, #tpu.memory_space<vmem>>, %arg9: memref<1x128xf32, #tpu.memory_space<vmem>>, %arg10: memref<1x1x32xf32, #tpu.memory_space<vmem>>) attributes {dimension_semantics = [#tpu.dimension_semantics<parallel>], iteration_bounds = array<i64: 2>, scalar_prefetch = 0 : i64, scratch_operands = 0 : i64, tpu.core_type = #tpu.core_type<tc>, window_params = [{transform_indices = @transform_0, window_bounds = array<i64: 32, 128>}, {transform_indices = @transform_1, window_bounds = array<i64: 32, 128>}, {pipeline_mode = #tpu.pipeline_mode<synchronous>, transform_indices = @transform_2, window_bounds = array<i64: 128, 128>}, {pipeline_mode = #tpu.pipeline_mode<synchronous>, transform_indices = @transform_3, window_bounds = array<i64: 1, 128>}, {pipeline_mode = #tpu.pipeline_mode<synchronous>, transform_indices = @transform_4, window_bounds = array<i64: 128, 128>}, {pipeline_mode = #tpu.pipeline_mode<synchronous>, transform_indices = @transform_5, window_bounds = array<i64: 1, 128>}, {pipeline_mode = #tpu.pipeline_mode<synchronous>, transform_indices = @transform_6, window_bounds = array<i64: 128, 128>}, {pipeline_mode = #tpu.pipeline_mode<synchronous>, transform_indices = @transform_7, window_bounds = array<i64: 1, 128>}, {pipeline_mode = #tpu.pipeline_mode<synchronous>, transform_indices = @transform_8, window_bounds = array<i64: 1, 128>}, {transform_indices = @transform_9, window_bounds = array<i64: 1, 1, 32>}]} {
    %c0 = arith.constant 0 : index
    %c0_0 = arith.constant 0 : index
    %0 = vector.load %arg1[%c0, %c0_0] : memref<32x128xi8, #tpu.memory_space<vmem>>, vector<32x128xi8>
    %1 = arith.sitofp %0 : vector<32x128xi8> to vector<32x128xbf16>
    %c0_1 = arith.constant 0 : index
    %c0_2 = arith.constant 0 : index
    %2 = vector.load %arg2[%c0_1, %c0_2] : memref<32x128xi8, #tpu.memory_space<vmem>>, vector<32x128xi8>
    %3 = arith.sitofp %2 : vector<32x128xi8> to vector<32x128xbf16>
    %c0_3 = arith.constant 0 : index
    %c0_4 = arith.constant 0 : index
    %4 = vector.load %arg3[%c0_3, %c0_4] : memref<128x128xbf16, #tpu.memory_space<vmem>>, vector<128x128xbf16>
    %cst = arith.constant dense<0.000000e+00> : vector<32x128xf32>
    %5 = tpu.matmul %1, %4, %cst {dimension_numbers = #tpu.dot_dimension_numbers<[1], [0], [0], [1], [0, 0, 1, 1], [], []>} : vector<32x128xbf16>, vector<128x128xbf16>, vector<32x128xf32> -> vector<32x128xf32>
    %c0_5 = arith.constant 0 : index
    %c0_6 = arith.constant 0 : index
    %6 = vector.load %arg4[%c0_5, %c0_6] : memref<1x128xf32, #tpu.memory_space<vmem>>, vector<1x128xf32>
    %7 = vector.broadcast %6 : vector<1x128xf32> to vector<32x128xf32>
    %8 = arith.addf %5, %7 : vector<32x128xf32>
    %c0_7 = arith.constant 0 : index
    %c0_8 = arith.constant 0 : index
    %9 = vector.load %arg5[%c0_7, %c0_8] : memref<128x128xbf16, #tpu.memory_space<vmem>>, vector<128x128xbf16>
    %cst_9 = arith.constant dense<0.000000e+00> : vector<32x128xf32>
    %10 = tpu.matmul %3, %9, %cst_9 {dimension_numbers = #tpu.dot_dimension_numbers<[1], [0], [0], [1], [0, 0, 1, 1], [], []>} : vector<32x128xbf16>, vector<128x128xbf16>, vector<32x128xf32> -> vector<32x128xf32>
    %c0_10 = arith.constant 0 : index
    %c0_11 = arith.constant 0 : index
    %11 = vector.load %arg6[%c0_10, %c0_11] : memref<1x128xf32, #tpu.memory_space<vmem>>, vector<1x128xf32>
    %12 = vector.broadcast %11 : vector<1x128xf32> to vector<32x128xf32>
    %13 = arith.addf %10, %12 : vector<32x128xf32>
    %14 = arith.mulf %8, %13 : vector<32x128xf32>
    %c0_12 = arith.constant 0 : index
    %c0_13 = arith.constant 0 : index
    %15 = vector.load %arg7[%c0_12, %c0_13] : memref<128x128xf32, #tpu.memory_space<vmem>>, vector<128x128xf32>
    %cst_14 = arith.constant dense<0.000000e+00> : vector<32x128xf32>
    %16 = tpu.matmul %14, %15, %cst_14 {dimension_numbers = #tpu.dot_dimension_numbers<[1], [0], [0], [1], [0, 0, 1, 1], [], []>} : vector<32x128xf32>, vector<128x128xf32>, vector<32x128xf32> -> vector<32x128xf32>
    %c0_15 = arith.constant 0 : index
    %c0_16 = arith.constant 0 : index
    %17 = vector.load %arg8[%c0_15, %c0_16] : memref<1x128xf32, #tpu.memory_space<vmem>>, vector<1x128xf32>
    %18 = vector.broadcast %17 : vector<1x128xf32> to vector<32x128xf32>
    %19 = arith.addf %16, %18 : vector<32x128xf32>
    %cst_17 = arith.constant 0.000000e+00 : f32
    %20 = vector.broadcast %cst_17 : f32 to vector<32x128xf32>
    %21 = arith.maximumf %19, %20 : vector<32x128xf32>
    %c0_18 = arith.constant 0 : index
    %c0_19 = arith.constant 0 : index
    %22 = vector.load %arg9[%c0_18, %c0_19] : memref<1x128xf32, #tpu.memory_space<vmem>>, vector<1x128xf32>
    %23 = vector.broadcast %22 : vector<1x128xf32> to vector<32x128xf32>
    %24 = arith.mulf %21, %23 : vector<32x128xf32>
    %cst_20 = arith.constant dense<0.000000e+00> : vector<32xf32>
    %25 = vector.multi_reduction <add>, %24, %cst_20 [1] : vector<32x128xf32> to vector<32xf32>
    %26 = vector.shape_cast %25 : vector<32xf32> to vector<1x1x32xf32>
    %c0_21 = arith.constant 0 : index
    %c0_22 = arith.constant 0 : index
    %c0_23 = arith.constant 0 : index
    %27 = vector.load %arg10[%c0_21, %c0_22, %c0_23] : memref<1x1x32xf32, #tpu.memory_space<vmem>>, vector<1x1x32xf32>
    tpu.vector_store %arg10[%c0_21, %c0_22, %c0_23], %26 {strides = array<i32>} : memref<1x1x32xf32, #tpu.memory_space<vmem>>, vector<1x1x32xf32>,
    return
  }
  func.func @transform_0(%arg0: i32) -> (i32, i32) {
    %c0_i32 = arith.constant 0 : i32
    %c0_i32_0 = arith.constant 0 : i32
    return %arg0, %c0_i32 : i32, i32
  }
  func.func @transform_1(%arg0: i32) -> (i32, i32) {
    %c0_i32 = arith.constant 0 : i32
    %c0_i32_0 = arith.constant 0 : i32
    return %arg0, %c0_i32 : i32, i32
  }
  func.func @transform_2(%arg0: i32) -> (i32, i32) {
    %c0_i32 = arith.constant 0 : i32
    %c0_i32_0 = arith.constant 0 : i32
    %c0_i32_1 = arith.constant 0 : i32
    return %c0_i32, %c0_i32_0 : i32, i32
  }
  func.func @transform_3(%arg0: i32) -> (i32, i32) {
    %c0_i32 = arith.constant 0 : i32
    %c0_i32_0 = arith.constant 0 : i32
    %c0_i32_1 = arith.constant 0 : i32
    return %c0_i32, %c0_i32_0 : i32, i32
  }
  func.func @transform_4(%arg0: i32) -> (i32, i32) {
    %c0_i32 = arith.constant 0 : i32
    %c0_i32_0 = arith.constant 0 : i32
    %c0_i32_1 = arith.constant 0 : i32
    return %c0_i32, %c0_i32_0 : i32, i32
  }
  func.func @transform_5(%arg0: i32) -> (i32, i32) {
    %c0_i32 = arith.constant 0 : i32
    %c0_i32_0 = arith.constant 0 : i32
    %c0_i32_1 = arith.constant 0 : i32
    return %c0_i32, %c0_i32_0 : i32, i32
  }
  func.func @transform_6(%arg0: i32) -> (i32, i32) {
    %c0_i32 = arith.constant 0 : i32
    %c0_i32_0 = arith.constant 0 : i32
    %c0_i32_1 = arith.constant 0 : i32
    return %c0_i32, %c0_i32_0 : i32, i32
  }
  func.func @transform_7(%arg0: i32) -> (i32, i32) {
    %c0_i32 = arith.constant 0 : i32
    %c0_i32_0 = arith.constant 0 : i32
    %c0_i32_1 = arith.constant 0 : i32
    return %c0_i32, %c0_i32_0 : i32, i32
  }
  func.func @transform_8(%arg0: i32) -> (i32, i32) {
    %c0_i32 = arith.constant 0 : i32
    %c0_i32_0 = arith.constant 0 : i32
    %c0_i32_1 = arith.constant 0 : i32
    return %c0_i32, %c0_i32_0 : i32, i32
  }
  func.func @transform_9(%arg0: i32) -> (i32, i32, i32) {
    %c0_i32 = arith.constant 0 : i32
    %c0_i32_0 = arith.constant 0 : i32
    %c0_i32_1 = arith.constant 0 : i32
    return %arg0, %c0_i32, %c0_i32_0 : i32, i32, i32
  }
}

</mosaic_0001>

<bundles_post_ra>
// kernel: tpu_custom_call.1
= control target key start
LH: loop header
LB: loop body
LE: loop exit
PB: predicated region body
PF: predicated region fallthrough
CT: control target
= control target key end

     0   :  { %s1777_s0 = inlined_call_operand.hbm [shape: s8[64,128], index: 0, kind: input, shape index: {}]   ;;  %s1778_s1 = inlined_call_operand.hbm [shape: s8[64,128], index: 1, kind: input, shape index: {}]   ;;  %s1779_s2 = inlined_call_operand.hbm [shape: bf16[128,128], index: 2, kind: input, shape index: {}]   ;;  %s1780_s3 = inlined_call_operand.vmem [shape: f32[1,128], index: 3, kind: input, shape index: {}]   ;;  %s1781_s4 = inlined_call_operand.hbm [shape: bf16[128,128], index: 4, kind: input, shape index: {}]   ;;  %s1782_s5 = inlined_call_operand.vmem [shape: f32[1,128], index: 5, kind: input, shape index: {}]   ;;  %s1783_s6 = inlined_call_operand.hbm [shape: f32[128,128], index: 6, kind: input, shape index: {}]   ;;  %s1784_s7 = inlined_call_operand.vmem [shape: f32[1,128], index: 7, kind: input, shape index: {}]   ;;  %s1785_s8 = inlined_call_operand.vmem [shape: f32[1,128], index: 8, kind: input, shape index: {}]   ;;  %s1786_s9 = inlined_call_operand.hbm [shape: f32[2,1,32], index: 9, kind: output, shape index: {}]  }
   0x1   :  { %1794 = sst [smem:[#allocation20_spill]] %s1779_s2 }
   0x2   :  { %1795 = sst [smem:[#allocation21_spill]] %s1781_s4 }
   0x3   :  { %1796 = sst [smem:[#allocation22_spill]] %s1783_s6 }
   0x4   :  { %14 = vsyncpa [#allocation3], 0 }
   0x5   :  { %16 = vsyncpa [#allocation3 + $0x1], 0 }
   0x6   :  { %17 = vsyncpa [#allocation6], 0 }
   0x7   :  { %19 = vsyncpa [#allocation6 + $0x1], 0 }
   0x8   :  { %20 = vsyncpa [#allocation9], 0 }
   0x9   :  { %21 = vsyncpa [#allocation4], 0 }
   0xa   :  { %23 = vsyncpa [#allocation4 + $0x1], 0  ;;  %s1536_s30 = smov 0   ;;  %s1538_s10 = smov 0  }
   0xb   :  { %s1540_s11 = smov 0   ;;  %s1542_s12 = smov 0  }
   0xc LB: > { %1797 = sst [smem:[#allocation17_spill]] %s1470_s11  ;;  %s1557_s13 = sadd.s32 4294967295, %s1474_s12   ;;  %s1474_s12 = sphi %s1542_s12, %s1819_s12   ;;  %s1470_s11 = sphi %s1540_s11, %s1821_s11   ;;  %s1466_s10 = sphi %s1538_s10, %s1823_s10   ;;  %s1462_s30 = sphi %s1536_s30, %s1822_s30  }
   0xd   : > { %s973_s14 = sadd.s32 4294967294, %s1474_s12   ;;  %p49_p0 = scmp.ne.s32.totalorder %s1466_s10, %s1462_s30 }
   0xe   : > { %p1787_p1 = scmp.eq.s32.totalorder %s1557_s13, 0  ;;  %p252_p3 = scmp.eq.s32.totalorder %s973_s14, 1 }
   0xf   : > { %p974_p5 = scmp.ge.s32.totalorder %s1474_s12, 1  ;;  %p259_p7 = scmp.lt.s32.totalorder %s1474_s12, 3 }
  0x10   : > { %p1566_p4 = por %p1787_p1, %p49_p0  ;;  %p1571_p6 = por %p252_p3, %p49_p0 }
  0x11   : > { %p1576_p8 = pnand %p974_p5, %p259_p7  ;;  %s1476_s18 = smov [#allocation7]  }
  0x12   : > { %s1798_s15 = scalar_select %p1566_p4, 1, 0 }
  0x13   : > { %s1799_s16 = scalar_select %p1571_p6, 1, 0 }
  0x14   : > { %s1800_s17 = scalar_select %p1576_p8, 1, 0 }
  0x15   : > { %s271_s19 = sshll.u32 %s1476_s18, 4  ;;  %p1180_p9 = pneg %p1576_p8  ;;  %s272_s19 = int_to_ptr.vmem [resolvable:$true] %s271_s19 }
  0x16   : > { %s1477_s21 = smov [#allocation8]   ;;  %s1478_s23 = smov [#allocation10]  }
  0x17   : > { %p1585_p11 = pnand %p1180_p9, %p1787_p1  ;;  %s287_s22 = sshll.u32 %s1477_s21, 4  ;;  %s288_s22 = int_to_ptr.vmem [resolvable:$true] %s287_s22 }
  0x18   : > { %s303_s24 = sshll.u32 %s1478_s23, 4  ;;  %s1275_s25 = scalar_lea.vmem %s272_s19, 1024  ;;  %s304_s24 = int_to_ptr.vmem [resolvable:$true] %s303_s24 }
  0x19   : > { %p1266_p12 = pneg %p1585_p11  ;;  %p1276_p13 = scmp.ne.s32.totalorder %s272_s19, %s1275_s25 }
  0x1a   : > { %p1283_p5 = scmp.lt.s32.totalorder %s272_s19, %s272_s19  ;;  %p1284_p7 = scmp.lt.s32.totalorder %s1275_s25, %s1275_s25 }
  0x1b   : > { %p1278_p0 = pnand %p1276_p13, %p1266_p12 }
  0x1c   : > { %p1285_p9 = por %p1284_p7, %p1283_p5 }
  0x1d   : > { %p1279_p3 = pneg %p1278_p0 }
  0x1f   : > { %p1286_p10 = pnand %p1285_p9, %p1279_p3 }
  0x21   : > { %1289 = shalt.err (!%p1286_p10)
}
  0x22   : > { %s1479_s26 = smov 64   ;;  %s1480_s27 = smov 4  }
  0x23   : > { %s1802_s2 = sld [smem:[#allocation20_spill]]  ;;  %s1301_s14 = scalar_lea.vmem %s288_s22, 1024 }
  0x24   : > { %p1302_p1 = scmp.ne.s32.totalorder %s288_s22, %s1301_s14  ;;  %p1309_p2 = scmp.lt.s32.totalorder %s288_s22, %s288_s22 }
  0x25   : > { %p1310_p6 = scmp.lt.s32.totalorder %s1301_s14, %s1301_s14 }
  0x26   : > { %p1304_p13 = pnand %p1302_p1, %p1266_p12 }
  0x27   : > { %p1311_p5 = por %p1310_p6, %p1309_p2 }
  0x28   : > { %p1305_p0 = pneg %p1304_p13 }
  0x29   : > { %1183 = dma.hbm_to_vmem [thread:$0]  (!%p1585_p11), %s1802_s2, 1024, %s272_s19, [#allocation6], %s1479_s26, %s1479_s26, %s1480_s27  }
  0x2a   : > { %p1312_p3 = pnand %p1311_p5, %p1305_p0 }
  0x2c   : > { %1315 = shalt.err (!%p1312_p3)
}
  0x2d   : > { %s1803_s4 = sld [smem:[#allocation21_spill]]  ;;  %s1327_s19 = scalar_lea.vmem %s304_s24, 2048 }
  0x2e   : > { %p1328_p10 = scmp.ne.s32.totalorder %s304_s24, %s1327_s19  ;;  %p1335_p9 = scmp.lt.s32.totalorder %s304_s24, %s304_s24 }
  0x2f   : > { %p1336_p13 = scmp.lt.s32.totalorder %s1327_s19, %s1327_s19 }
  0x30   : > { %p1330_p7 = pnand %p1328_p10, %p1266_p12 }
  0x31   : > { %p1337_p4 = por %p1336_p13, %p1335_p9 }
  0x32   : > { %p1331_p1 = pneg %p1330_p7 }
  0x33   : > { %1186 = dma.hbm_to_vmem [thread:$0]  (!%p1585_p11), %s1803_s4, 1024, %s288_s22, [#allocation9], %s1479_s26, %s1479_s26, %s1480_s27  }
  0x34   : > { %p1338_p2 = pnand %p1337_p4, %p1331_p1 }
  0x36   : > { %1341 = shalt.err (!%p1338_p2)
}
  0x37   : > { %s1481_s23 = smov 128   ;;  %s1482_s22 = smov 8  }
  0x38   : > { %s1804_s6 = sld [smem:[#allocation22_spill]]  ;;  %s1616_s27 = sadd.s32 1, %s1474_s12  }
  0x39   : > { %1805 = sst [smem:[#allocation18_spill]] %s1616_s27  ;;  %s33_s28 = ssub.s32 %s1474_s12, %s1616_s27 }
  0x3a   : > { %s36_s29 = sadd.s32 1, %s1470_s11  ;;  %p34_p4 = scmp.eq.s32.totalorder %s33_s28, 0 }
  0x3b   : > { %p43_p6 = scmp.ne.s32.totalorder %s1470_s11, %s1466_s10  ;;  %p44_p12 = scmp.eq.s32.totalorder %s1474_s12, 0 }
  0x3c   : > { %p1204_p0 = scmp.lt.s32.totalorder %s1474_s12, 2  ;;  %p1807_p3 = scmp.eq.s32.totalorder %s1557_s13, 1 }
  0x3d   : > { %s1626_s14 = scalar_select %p34_p4, %s1470_s11, %s36_s29  }
  0x3e   : > { %1189 = dma.hbm_to_vmem [thread:$0]  (!%p1585_p11), %s1804_s6, 2048, %s304_s24, [#allocation9], %s1481_s23, %s1481_s23, %s1482_s22  }
  0x3f   : > { %1806 = sst [smem:[#allocation19_spill]] %s1626_s14  ;;  %p45_p5 = por %p44_p12, %p43_p6 }
  0x40   : > { %p1630_p10 = por %p1807_p3, %p43_p6  ;;  %s323_s20 = sand.u32 1, %s1470_s11  }
  0x41   : > { %s980_s21 = sshll.u32 %s1474_s12, 7  ;;  %s1636_s24 = sshll.u32 %s323_s20, 3 }
  0x42   : > { %s1808_s18 = scalar_select %p1630_p10, 1, 0 }
  0x43   : > { %s1641_s22 = scalar_lea.hbm %s1777_s0, %s980_s21  ;;  %s327_s25 = scalar_lea.vmem [#allocation2], %s1636_s24 }
  0x44   : > { %s334_s26 = sshll.u32 %s327_s25, 4  ;;  %p1644_p11 = pnand %p1204_p0, %p45_p5  ;;  %s335_s26 = int_to_ptr.vmem [resolvable:$true] %s334_s26 }
  0x45   : > { %s1651_s4 = scalar_lea.hbm %s1778_s1, %s980_s21  ;;  %s324_s19 = scalar_lea.sflag [#allocation3], %s323_s20 }
  0x46   : > { %s1342_s23 = scalar_lea.hbm %s1641_s22, 128  ;;  %p1344_p1 = pneg %p1644_p11 }
  0x47   : > { %p1343_p7 = scmp.ne.s32.totalorder %s1641_s22, %s1342_s23  ;;  %s1347_s14 = scalar_lea.hbm %s1777_s0, 256 }
  0x48   : > { %p1348_p2 = scmp.lt.s32.totalorder %s1641_s22, %s1777_s0  ;;  %p1349_p4 = scmp.lt.s32.totalorder %s1347_s14, %s1342_s23 }
  0x49   : > { %p1345_p9 = pnand %p1344_p1, %p1343_p7 }
  0x4a   : > { %p1350_p6 = por %p1349_p4, %p1348_p2 }
  0x4b   : > { %p1346_p13 = pneg %p1345_p9 }
  0x4d   : > { %p1351_p12 = pnand %p1350_p6, %p1346_p13 }
  0x4f   : > { %1354 = shalt.err (!%p1351_p12)
}
  0x50   : > { %s1355_s2 = scalar_lea.vmem %s335_s26, 128  ;;  %s1483_s20 = smov [#allocation2]  }
  0x51   : > { %p1356_p0 = scmp.ne.s32.totalorder %s335_s26, %s1355_s2  ;;  %s1360_s21 = sshll.u32 %s1483_s20, 4  ;;  %s1361_s21 = int_to_ptr.vmem [resolvable:$false] %s1360_s21 }
  0x52   : > { %s1362_s6 = scalar_lea.vmem %s1361_s21, 256  ;;  %p1363_p7 = scmp.lt.s32.totalorder %s335_s26, %s1361_s21 }
  0x53   : > { %p1358_p5 = pnand %p1356_p0, %p1344_p1  ;;  %p1364_p9 = scmp.lt.s32.totalorder %s1362_s6, %s1355_s2 }
  0x55   : > { %p1359_p3 = pneg %p1358_p5  ;;  %p1365_p10 = por %p1364_p9, %p1363_p7 }
  0x57   : > { %p1366_p8 = pnand %p1365_p10, %p1359_p3 }
  0x59   : > { %1369 = shalt.err (!%p1366_p8)
}
  0x5a   : > { %1193 = dma.hbm_to_vmem [thread:$0]  (!%p1644_p11), %s1641_s22, 128, %s335_s26, %s324_s19  }
  0x5b   : > { %s341_s11 = sand.u32 1, %s1474_s12   ;;  %s345_s27 = scalar_lea.vmem [#allocation5], %s1636_s24 }
  0x5c   : > { %s352_s14 = sshll.u32 %s345_s27, 4  ;;  %s342_s29 = scalar_lea.sflag [#allocation6], %s341_s11  ;;  %s353_s14 = int_to_ptr.vmem [resolvable:$true] %s352_s14 }
  0x5d   : > { %s1370_s23 = scalar_lea.hbm %s1651_s4, 128  ;;  %s1375_s20 = scalar_lea.hbm %s1778_s1, 256 }
  0x5e   : > { %p1371_p13 = scmp.ne.s32.totalorder %s1651_s4, %s1370_s23  ;;  %p1376_p2 = scmp.lt.s32.totalorder %s1651_s4, %s1778_s1 }
  0x5f   : > { %p1377_p4 = scmp.lt.s32.totalorder %s1375_s20, %s1370_s23 }
  0x60   : > { %p1373_p8 = pnand %p1371_p13, %p1344_p1 }
  0x61   : > { %p1378_p6 = por %p1377_p4, %p1376_p2 }
  0x62   : > { %p1374_p10 = pneg %p1373_p8 }
  0x64   : > { %p1379_p12 = pnand %p1378_p6, %p1374_p10 }
  0x66   : > { %1382 = shalt.err (!%p1379_p12)
}
  0x67   : > { %s1383_s24 = scalar_lea.vmem %s353_s14, 128  ;;  %s1484_s22 = smov [#allocation5]  }
  0x68   : > { %p1384_p0 = scmp.ne.s32.totalorder %s353_s14, %s1383_s24  ;;  %s1388_s26 = sshll.u32 %s1484_s22, 4  ;;  %s1389_s26 = int_to_ptr.vmem [resolvable:$false] %s1388_s26 }
  0x69   : > { %s1390_s19 = scalar_lea.vmem %s1389_s26, 256  ;;  %p1391_p7 = scmp.lt.s32.totalorder %s353_s14, %s1389_s26 }
  0x6a   : > { %p1386_p5 = pnand %p1384_p0, %p1344_p1  ;;  %p1392_p9 = scmp.lt.s32.totalorder %s1390_s19, %s1383_s24 }
  0x6c   : > { %p1387_p3 = pneg %p1386_p5  ;;  %p1393_p13 = por %p1392_p9, %p1391_p7 }
  0x6e   : > { %p1394_p8 = pnand %p1393_p13, %p1387_p3 }
  0x70   : > { %1397 = shalt.err (!%p1394_p8)
}
  0x71   : > { %1196 = dma.hbm_to_vmem [thread:$0]  (!%p1644_p11), %s1651_s4, 128, %s353_s14, %s342_s29  }
  0x72   : > { %p1810_p10 = scmp.ne.s32.totalorder %s1800_s17, 0 }
  0x73   : > { %s1696_s11 = sand.u32 (!%p1810_p10), 1, %s1466_s10   ;;  %p1811_p1 = scmp.ne.s32.totalorder (!%p1810_p10), %s1798_s15, 0 }
  0x74   : > { %361 = sbr.rel (%p1810_p10) target bundleno = 730 (0x2da), region = 56  ;;  %s984_s27 = sshll.u32 (!%p1810_p10), %s1696_s11, 3 }
  0x75   : > { %s364_s23 = scalar_lea.sflag (!%p1810_p10), [#allocation3], %s1696_s11  ;;  %s1700_s25 = scalar_lea.vmem (!%p1810_p10), [#allocation2], %s984_s27 }
  0x79   : > { %1441 = dma.done.wait (%p1811_p1), %s364_s23, 128  }
  0x7a   : > { %1443 = vsyncadd (%p1811_p1), %s364_s23, 4294967168  ;;  %s372_s4 = sand.u32 1, %s1557_s13   ;;  %s1707_s28 = scalar_lea.vmem [#allocation5], %s984_s27 }
  0x7b   : > { %s373_s17 = scalar_lea.sflag [#allocation6], %s372_s4 }
  0x7c   : > { %1445 = dma.done.wait (%p1811_p1), %s373_s17, 128  }
  0x7d   : > { %1447 = vsyncadd (%p1811_p1), %s373_s17, 4294967168  ;;  %p1812_p11 = scmp.eq.s32.totalorder %s1557_s13, 0 }
  0x7f   : > { %1449 = dma.done.wait (%p1812_p11), [#allocation6], 1024   ;;  %p1813_p2 = pmov %p1812_p11 }
  0x81   : > { %1451 = vsyncadd (%p1813_p2), [#allocation6], 4294966272  ;;  %p1814_p4 = pmov %p1813_p2 }
  0x82   : > { %p1815_p6 = pmov %p1813_p2 }
  0x83   : > { %1453 = dma.done.wait (%p1814_p4), [#allocation9], 3072  }
  0x84   : > { %1455 = vsyncadd (%p1815_p6), [#allocation9], 4294964224  ;;  %v1248_v0 = vld [vmem:[#allocation7 + $0x38] sm:$0xff]   ;;  %v1250_v2 = vld [vmem:[#allocation7 + $0x30] sm:$0xff]   ;;  %vm824_vm0 = vcmask 130112   ;;  %vm831_vm1 = vcmask 195712  }
  0x85   : > { %v1249_v1 = vld [vmem:[#allocation8 + $0x38] sm:$0xff]   ;;  %1052 = vmatprep.subr.bf16.mxu0 %v1248_v0  ;;  %v1251_v3 = vld [vmem:[#allocation8 + $0x30] sm:$0xff]   ;;  %v1252_v4 = vld [vmem:[#allocation7 + $0x28] sm:$0xff]   ;;  %s1009_s22 = sshll.u32 %s1557_s13, 4  ;;  %s426_s26 = scalar_lea.vmem [#allocation11], %s1696_s11  ;;  %vm838_vm2 = vcmask 261312  }
  0x86   : > { %1072 = vmatprep.subr.bf16.mxu1 %v1249_v1  ;;  %1053 = vmatpush3.bf16.msra.mxu0 %v1248_v0  ;;  %v1253_v5 = vld [vmem:[#allocation8 + $0x28] sm:$0xff]   ;;  %v1254_v6 = vld [vmem:[#allocation7 + $0x20] sm:$0xff]   ;;  %v1256_v8 = vld [vmem:[#allocation7 + $0x18] sm:$0xff]   ;;  %s856_s19 = sshll.u32 %s426_s26, 4  ;;  %vm841_vm3 = vcmask 253952   ;;  %s844_s4 = scalar_lea.sflag [#allocation4], %s1696_s11  ;;  %s857_s19 = int_to_ptr.vmem [resolvable:$true] %s856_s19 }
  0x87   : > { %1073 = vmatpush3.bf16.msra.mxu1 %v1249_v1  ;;  %1054 = vmatprep.subr.bf16.mxu0 %v1250_v2  ;;  %v1255_v7 = vld [vmem:[#allocation8 + $0x20] sm:$0xff]   ;;  %v1257_v9 = vld [vmem:[#allocation8 + $0x18] sm:$0xff]   ;;  %v1258_v10 = vld [vmem:[#allocation7 + $0x10] sm:$0xff]   ;;  %s1398_s17 = scalar_lea.vmem %s857_s19, 16  ;;  %p1816_p0 = scmp.ne.s32.totalorder %s1808_s18, 0 }
  0x88   : > { %1074 = vmatprep.subr.bf16.mxu1 %v1251_v3  ;;  %v428_v11 = vld [vmem:[%s1700_s25] sm:$0xff]  ;;  %v431_v12 = vld [vmem:[%s1707_s28] sm:$0xff]  ;;  %s1740_s25 = scalar_lea.hbm %s1786_s9, %s1009_s22  ;;  %p1399_p12 = scmp.ne.s32.totalorder %s857_s19, %s1398_s17 }
  0x89   : > { %v1259_v13 = vld [vmem:[#allocation8 + $0x10] sm:$0xff]   ;;  %v429_v14 = vunpack.c.l.s8.bf16 %v428_v11  ;;  %v432_v15 = vunpack.c.l.s8.bf16 %v431_v12  ;;  %v1260_v16 = vld [vmem:[#allocation7 + $0x8] sm:$0xff]   ;;  %v1262_v18 = vld [vmem:[#allocation7] sm:$0xff]   ;;  %v430_v20 = vunpack.c.h.s8.bf16 %v428_v11  ;;  %v433_v22 = vunpack.c.h.s8.bf16 %v431_v12  ;;  %s1485_s13 = smov [#allocation11]  }
  0x8a   : > { %1055 = vmatpush3.bf16.msra.mxu0 %v1250_v2  ;;  %v1261_v17 = vld [vmem:[#allocation8 + $0x8] sm:$0xff]   ;;  %v1263_v19 = vld [vmem:[#allocation8] sm:$0xff]   ;;  %v693_v21 = vld [vmem:[#allocation10 + $0x78] sm:$0xff]  ;;  %p1400_p5 = pnand %p1399_p12, %p1816_p0  ;;  %s1402_s28 = sshll.u32 %s1485_s13, 4  ;;  %s1403_s28 = int_to_ptr.vmem [resolvable:$false] %s1402_s28 }
  0x8b   : > { %1075 = vmatpush3.bf16.msra.mxu1 %v1251_v3  ;;  %1056 = vmatprep.subr.bf16.mxu0 %v1252_v4  ;;  %v692_v23 = vld [vmem:[#allocation10 + $0x70] sm:$0xff]  ;;  %v691_v24 = vld [vmem:[#allocation10 + $0x68] sm:$0xff]  ;;  %v690_v25 = vld [vmem:[#allocation10 + $0x60] sm:$0xff]  ;;  %s1404_s15 = scalar_lea.vmem %s1403_s28, 32  ;;  %p1405_p7 = scmp.lt.s32.totalorder %s857_s19, %s1403_s28 }
  0x8c   : > { %1076 = vmatprep.subr.bf16.mxu1 %v1253_v5  ;;  %1068 = vmatprep.mubr.bf16.mxu0 %v429_v14  ;;  %v689_v26 = vld [vmem:[#allocation10 + $0x58] sm:$0xff]  ;;  %v688_v27 = vld [vmem:[#allocation10 + $0x50] sm:$0xff]  ;;  %v687_v28 = vld [vmem:[#allocation10 + $0x48] sm:$0xff]  ;;  %v813_v14 = vlaneseq  ;;  %p1401_p3 = pneg %p1400_p5  ;;  %p1406_p9 = scmp.lt.s32.totalorder %s1404_s15, %s1398_s17 }
  0x8d   : > { %1088 = vmatprep.mubr.bf16.mxu1 %v432_v15  ;;  %v686_v29 = vld [vmem:[#allocation10 + $0x40] sm:$0xff]  ;;  %v685_v30 = vld [vmem:[#allocation10 + $0x38] sm:$0xff]  ;;  %v684_v31 = vld [vmem:[#allocation10 + $0x30] sm:$0xff] }
  0x8e   : > { %1057 = vmatpush3.bf16.msra.mxu0 %v1252_v4  ;;  %v683_v32 = vld [vmem:[#allocation10 + $0x28] sm:$0xff]  ;;  %v682_v33 = vld [vmem:[#allocation10 + $0x20] sm:$0xff]  ;;  %v681_v34 = vld [vmem:[#allocation10 + $0x18] sm:$0xff]  ;;  %v814_v15 = vand.u32 127, %v813_v14  ;;  %p1407_p13 = por %p1406_p9, %p1405_p7 }
  0x8f   : > { %1077 = vmatpush3.bf16.msra.mxu1 %v1253_v5  ;;  %1058 = vmatprep.subr.bf16.mxu0 %v1254_v6  ;;  %v680_v35 = vld [vmem:[#allocation10 + $0x10] sm:$0xff]  ;;  %v679_v36 = vld [vmem:[#allocation10 + $0x8] sm:$0xff]  ;;  %v678_v37 = vld [vmem:[#allocation10] sm:$0xff] }
  0x90   : > { %1078 = vmatprep.subr.bf16.mxu1 %v1255_v7  ;;  %v989_v38 = vld [vmem:[%s1780_s3] ss:$0 sm:$0xff]  ;;  %p1408_p8 = pnand %p1407_p13, %p1401_p3 }
  0x91   : > { %v998_v39 = vld [vmem:[%s1782_s5] ss:$0 sm:$0xff] }
  0x92   : > { %1059 = vmatpush3.bf16.msra.mxu0 %v1254_v6  ;;  %v1007_v60 = vld [vmem:[%s1784_s7] ss:$0 sm:$0xff] }
  0x93   : > { %1079 = vmatpush3.bf16.msra.mxu1 %v1255_v7  ;;  %1060 = vmatprep.subr.bf16.mxu0 %v1256_v8  ;;  %v1008_v6 = vld [vmem:[%s1785_s8] ss:$0 sm:$0xff] }
  0x94   : > { %1080 = vmatprep.subr.bf16.mxu1 %v1257_v9 }
  0x96   : > { %1061 = vmatpush3.bf16.msra.mxu0 %v1256_v8 }
  0x97   : > { %1081 = vmatpush3.bf16.msra.mxu1 %v1257_v9  ;;  %1062 = vmatprep.subr.bf16.mxu0 %v1258_v10 }
  0x98   : > { %1082 = vmatprep.subr.bf16.mxu1 %v1259_v13 }
  0x9a   : > { %1063 = vmatpush3.bf16.msra.mxu0 %v1258_v10 }
  0x9b   : > { %1083 = vmatpush3.bf16.msra.mxu1 %v1259_v13  ;;  %1064 = vmatprep.subr.bf16.mxu0 %v1260_v16 }
  0x9c   : > { %1084 = vmatprep.subr.bf16.mxu1 %v1261_v17 }
  0x9e   : > { %1065 = vmatpush3.bf16.msra.mxu0 %v1260_v16  ;;  %v819_v16 = vadd.s32 4294967288, %v814_v15 }
  0x9f   : > { %1085 = vmatpush3.bf16.msra.mxu1 %v1261_v17  ;;  %1066 = vmatprep.subr.bf16.mxu0 %v1262_v18  ;;  %v816_v17 = vshrl.u32 %v813_v14, 7 }
  0xa0   : > { %1086 = vmatprep.subr.bf16.mxu1 %v1263_v19 }
  0xa2   : > { %1067 = vmatpush3.bf16.msra.mxu0 %v1262_v18  ;;  %v826_v18 = vadd.s32 4294967280, %v814_v15 }
  0xa3   : > { %1087 = vmatpush3.bf16.msra.mxu1 %v1263_v19  ;;  %1092 = vmatprep.subr.mxu0 %v693_v21 }
  0xa4   : > { %1130 = vmatprep.subr.mxu1 %v693_v21 }
  0xa5   : > { %1069 = vmatmul.mubr.bf16.vlgmr.msra.gmra.mxu0 %v430_v20  ;;  %v833_v20 = vadd.s32 4294967272, %v814_v15 }
  0xa6   : > { %1089 = vmatmul.mubr.bf16.vlgmr.msra.gmra.mxu1 %v433_v22  ;;  %1093 = vmatpush3.msra.mxu0 %v693_v21  ;;  %v817_v22 = vsub.s32 %v814_v15, %v816_v17 }
  0xa7   : > { %1146 = vmatpush3.msra.mxu1 %v693_v21  ;;  %1094 = vmatprep.subr.mxu0 %v692_v23 }
  0xa8   : > { %1131 = vmatprep.subr.mxu1 %v692_v23  ;;  %1095 = vmatpush3.msra.mxu0 %v692_v23 }
  0xa9   : > { %1147 = vmatpush3.msra.mxu1 %v692_v23  ;;  %1096 = vmatprep.subr.mxu0 %v691_v24  ;;  %v822_v23 = vsub.s32 %v819_v16, %v816_v17 }
  0xaa   : > { %1132 = vmatprep.subr.mxu1 %v691_v24  ;;  %1097 = vmatpush3.msra.mxu0 %v691_v24 }
  0xab   : > { %1148 = vmatpush3.msra.mxu1 %v691_v24  ;;  %1098 = vmatprep.subr.mxu0 %v690_v25  ;;  %v829_v24 = vsub.s32 %v826_v18, %v816_v17 }
  0xac   : > { %1133 = vmatprep.subr.mxu1 %v690_v25  ;;  %1099 = vmatpush3.msra.mxu0 %v690_v25 }
  0xad   : > { %1149 = vmatpush3.msra.mxu1 %v690_v25  ;;  %1100 = vmatprep.subr.mxu0 %v689_v26  ;;  %v836_v25 = vsub.s32 %v833_v20, %v816_v17 }
  0xae   : > { %1134 = vmatprep.subr.mxu1 %v689_v26  ;;  %1101 = vmatpush3.msra.mxu0 %v689_v26 }
  0xaf   : > { %1150 = vmatpush3.msra.mxu1 %v689_v26  ;;  %1102 = vmatprep.subr.mxu0 %v688_v27 }
  0xb0   : > { %1135 = vmatprep.subr.mxu1 %v688_v27  ;;  %1103 = vmatpush3.msra.mxu0 %v688_v27 }
  0xb1   : > { %1151 = vmatpush3.msra.mxu1 %v688_v27  ;;  %1104 = vmatprep.subr.mxu0 %v687_v28 }
  0xb2   : > { %1136 = vmatprep.subr.mxu1 %v687_v28  ;;  %1105 = vmatpush3.msra.mxu0 %v687_v28 }
  0xb3   : > { %1152 = vmatpush3.msra.mxu1 %v687_v28  ;;  %1106 = vmatprep.subr.mxu0 %v686_v29 }
  0xb4   : > { %1137 = vmatprep.subr.mxu1 %v686_v29  ;;  %1107 = vmatpush3.msra.mxu0 %v686_v29 }
  0xb5   : > { %1153 = vmatpush3.msra.mxu1 %v686_v29  ;;  %1108 = vmatprep.subr.mxu0 %v685_v30 }
  0xb6   : > { %1138 = vmatprep.subr.mxu1 %v685_v30  ;;  %1109 = vmatpush3.msra.mxu0 %v685_v30 }
  0xb7   : > { %1154 = vmatpush3.msra.mxu1 %v685_v30  ;;  %1110 = vmatprep.subr.mxu0 %v684_v31 }
  0xb8   : > { %1139 = vmatprep.subr.mxu1 %v684_v31  ;;  %1111 = vmatpush3.msra.mxu0 %v684_v31 }
  0xb9   : > { %1155 = vmatpush3.msra.mxu1 %v684_v31  ;;  %1112 = vmatprep.subr.mxu0 %v683_v32 }
  0xba   : > { %1140 = vmatprep.subr.mxu1 %v683_v32  ;;  %1113 = vmatpush3.msra.mxu0 %v683_v32 }
  0xbb   : > { %1156 = vmatpush3.msra.mxu1 %v683_v32  ;;  %1114 = vmatprep.subr.mxu0 %v682_v33 }
  0xbc   : > { %1141 = vmatprep.subr.mxu1 %v682_v33  ;;  %1115 = vmatpush3.msra.mxu0 %v682_v33 }
  0xbd   : > { %1157 = vmatpush3.msra.mxu1 %v682_v33  ;;  %1116 = vmatprep.subr.mxu0 %v681_v34 }
  0xbe   : > { %1142 = vmatprep.subr.mxu1 %v681_v34  ;;  %1117 = vmatpush3.msra.mxu0 %v681_v34 }
  0xbf   : > { %1158 = vmatpush3.msra.mxu1 %v681_v34  ;;  %1118 = vmatprep.subr.mxu0 %v680_v35 }
  0xc0   : > { %1143 = vmatprep.subr.mxu1 %v680_v35  ;;  %1119 = vmatpush3.msra.mxu0 %v680_v35 }
  0xc1   : > { %1159 = vmatpush3.msra.mxu1 %v680_v35  ;;  %1120 = vmatprep.subr.mxu0 %v679_v36 }
  0xc2   : > { %1144 = vmatprep.subr.mxu1 %v679_v36  ;;  %1121 = vmatpush3.msra.mxu0 %v679_v36 }
  0xc3   : > { %1160 = vmatpush3.msra.mxu1 %v679_v36  ;;  %1122 = vmatprep.subr.mxu0 %v678_v37 }
  0xc4   : > { %1145 = vmatprep.subr.mxu1 %v678_v37  ;;  %1123 = vmatpush3.msra.mxu0 %v678_v37 }
  0xc5   : > { %1161 = vmatpush3.msra.mxu1 %v678_v37 }
 0x165   : > { %v1070_v40 = vpop.f32.mrf.mxu0 }
 0x166   : > { %v548_v41 = vadd.f32 %v1070_v40, %v989_v38  ;;  %v1090_v42 = vpop.f32.mrf.mxu1 }
 0x167   : > { %v668_v43 = vadd.f32 %v1090_v42, %v998_v39  ;;  %v539_v44 = vpop.f32.mrf.mxu0 }
 0x168   : > { %v540_v45 = vadd.f32 %v989_v38, %v539_v44  ;;  %v659_v46 = vpop.f32.mrf.mxu1 }
 0x169   : > { %v676_v47 = vmul.f32 %v668_v43, %v548_v41  ;;  %v660_v48 = vadd.f32 %v998_v39, %v659_v46  ;;  %v1071_v49 = vpop.f32.mrf.mxu0 }
 0x16a   : > { %v551_v50 = vadd.f32 %v1071_v49, %v989_v38  ;;  %v1091_v51 = vpop.f32.mrf.mxu1 }
 0x16b   : > { %v674_v52 = vmul.f32 %v660_v48, %v540_v45  ;;  %v671_v53 = vadd.f32 %v1091_v51, %v998_v39  ;;  %1127 = vmatprep.mubr.f32.mxu1 %v676_v47  ;;  %v542_v54 = vpop.f32.mrf.mxu0 }
 0x16c   : > { %v543_v55 = vadd.f32 %v989_v38, %v542_v54  ;;  %v662_v56 = vpop.f32.mrf.mxu1 }
 0x16d   : > { %v677_v57 = vmul.f32 %v671_v53, %v551_v50  ;;  %v663_v58 = vadd.f32 %v998_v39, %v662_v56  ;;  %1124 = vmatprep.mubr.f32.mxu0 %v674_v52 }
 0x16f   : > { %v675_v59 = vmul.f32 %v663_v58, %v543_v55  ;;  %1128 = vmatmul.mubr.f32.vlgmr.msra.gmra.mxu1 %v677_v57 }
 0x171   : > { %1125 = vmatmul.mubr.f32.vlgmr.msra.gmra.mxu0 %v675_v59 }
 0x22f   : > { %v1129_v61 = vpop.f32.mrf.mxu1 }
 0x230   : > { %v783_v0 = vadd.f32 %v1129_v61, %v1007_v60 }
 0x231   : > { %v1126_v62 = vpop.f32.mrf.mxu0  ;;  %v777_v63 = vpop.f32.mrf.mxu1 }
 0x232   : > { %v778_v1 = vadd.f32 %v1007_v60, %v777_v63  ;;  %v773_v3 = vadd.f32 %v1126_v62, %v1007_v60  ;;  %v789_v7 = vmax.f32 %v783_v0, 0.0 }
 0x233   : > { %v767_v2 = vpop.f32.mrf.mxu0 }
 0x234   : > { %v788_v4 = vmax.f32 %v778_v1, 0.0  ;;  %v768_v5 = vadd.f32 %v1007_v60, %v767_v2  ;;  %v787_v10 = vmax.f32 %v773_v3, 0.0  ;;  %v800_v12 = vmul.f32 %v1008_v6, %v789_v7 }
 0x236   : > { %v786_v8 = vmax.f32 %v768_v5, 0.0  ;;  %v799_v9 = vmul.f32 %v1008_v6, %v788_v4  ;;  %v798_v13 = vmul.f32 %v1008_v6, %v787_v10 }
 0x238   : > { %805 = vadd.xlane.f32.xlu1 %v799_v9  ;;  %v797_v11 = vmul.f32 %v1008_v6, %v786_v8 }
 0x23a   : > { %801 = vadd.xlane.f32.xlu0 %v797_v11 }
 0x23c   : > { %807 = vadd.xlane.f32.xlu1 %v800_v12 }
 0x23e   : > { %803 = vadd.xlane.f32.xlu0 %v798_v13 }
 0x2c1   : > { %v806_v19 = vpop.xlane.xlu1 %805 }
 0x2c2   : > { %v830_v30 = vrot.slane %v806_v19, %v829_v24 }
 0x2c3   : > { %v802_v21 = vpop.xlane.xlu0 %801 }
 0x2c4   : > { %v818_v28 = vrot.slane %v802_v21, %v817_v22 }
 0x2c5   : > { %v808_v26 = vpop.xlane.xlu1 %807 }
 0x2c6   : > { %v837_v31 = vrot.slane %v808_v26, %v836_v25 }
 0x2c7   : > { %v804_v27 = vpop.xlane.xlu0 %803 }
 0x2c8   : > { %v823_v29 = vrot.slane %v804_v27, %v822_v23 }
 0x2ca   : > { %v825_v32 = vsel %vm824_vm0, %v823_v29, %v818_v28 }
 0x2cb   : > { %v832_v33 = vsel %vm831_vm1, %v830_v30, %v825_v32 }
 0x2cc   : > { %v839_v34 = vsel %vm838_vm2, %v837_v31, %v832_v33 }
 0x2cd   : > { %842 = vst.msk [vmem:[%s426_s26] sm:$0x1] %vm841_vm3, %v839_v34 }
 0x2ce   : > { %1411 = shalt.err (!%p1408_p8)
}
 0x2cf   : > { %s1412_s14 = scalar_lea.hbm %s1740_s25, 16  ;;  %s1416_s2 = scalar_lea.hbm %s1786_s9, 32 }
 0x2d0   : > { %p1413_p10 = scmp.ne.s32.totalorder %s1740_s25, %s1412_s14  ;;  %p1417_p2 = scmp.lt.s32.totalorder %s1740_s25, %s1786_s9 }
 0x2d1   : > { %p1418_p4 = scmp.lt.s32.totalorder %s1416_s2, %s1412_s14 }
 0x2d2   : > { %p1414_p1 = pnand %p1413_p10, %p1816_p0 }
 0x2d3   : > { %p1419_p6 = por %p1418_p4, %p1417_p2 }
 0x2d4   : > { %p1415_p11 = pneg %p1414_p1 }
 0x2d6   : > { %p1420_p12 = pnand %p1419_p6, %p1415_p11 }
 0x2d8   : > { %1423 = shalt.err (!%p1420_p12)
}
 0x2d9   : > { %1178 = dma.vmem_to_hbm [thread:$0]  (%p1816_p0), %s857_s19, 16, %s1740_s25, %s844_s4  }
 0x2da PF: > { %s868_s6 = sand.u32 1, %s1462_s30   ;;  %p1817_p5 = scmp.ne.s32.totalorder %s1799_s16, 0 }
 0x2db   : > { %p1818_p3 = scmp.ge.s32.totalorder %s1474_s12, 2  ;;  %s869_s24 = scalar_lea.sflag [#allocation4], %s868_s6 }
 0x2dd   : > { %p1198_p7 = pnand %p1818_p3, %p1817_p5 }
 0x2df   : > { %p1199_p9 = pneg %p1198_p7 }
 0x2e1   : > { %1457 = dma.done.wait (%p1199_p9), %s869_s24, 16  }
 0x2e2   : > { %1459 = vsyncadd (%p1199_p9), %s869_s24, 4294967280  ;;  %s1819_s12 = sld [smem:[#allocation18_spill]]  ;;  %s1822_s30 = smov %s1466_s10 }
 0x2e3   : > { %s1820_s22 = sld [smem:[#allocation17_spill]] }
 0x2e4   : > { %s1821_s11 = sld [smem:[#allocation19_spill]] }
 0x2e8   : > { %p26_p13 = scmp.ge.s32.totalorder %s1819_s12, 4  }
 0x2e9   : > { %s1823_s10 = smov %s1820_s22 }
 0x2ea   :  { %28 = sbr.rel (!%p26_p13) target bundleno = 12 (0xc), region = 126 }
 0x2ef   :  { %873 = vsyncpa [#allocation3], 1 }
 0x2f0   :  { %875 = vsyncpa [#allocation3 + $0x1], 1 }
 0x2f1   :  { %876 = vsyncpa [#allocation6], 1 }
 0x2f2   :  { %878 = vsyncpa [#allocation6 + $0x1], 1 }
 0x2f3   :  { %879 = vsyncpa [#allocation9], 1 }
 0x2f4   :  { %880 = vsyncpa [#allocation4], 1 }
 0x2f5   :  { %882 = vsyncpa [#allocation4 + $0x1], 1 }

</bundles_post_ra>
